<compile_context>
chip_gen: v7x
topology: tpu7x:2x2x1
jax: 0.10.0
libtpu: 0.0.40
codegen_flags: <defaults>
</compile_context>

<pallas_src>
import jax
import jax.numpy as jnp
from jax.experimental import pallas as pl
from jax.experimental.pallas import tpu as pltpu


def mfm_kernel(w_ref, b_ref, p_ref, o_ref):
    # w_ref: (2*Cout, KKC)   fused weights for both MFM branches
    # b_ref: (2*Cout, 1)     fused bias (broadcast along the lane axis)
    # p_ref: (1, KKC, tile_m) im2col patch columns for this (batch, tile)
    # o_ref: (1, Cout, tile_m) lane-dense output block
    cout = o_ref.shape[1]
    y = jnp.dot(w_ref[...], p_ref[0],
                preferred_element_type=jnp.float32)      # (2*Cout, tile_m) on MXU
    y = y + b_ref[...]                                   # lane-broadcast bias add
    o_ref[0] = jnp.maximum(y[:cout, :], y[cout:, :]).astype(o_ref.dtype)


def mfm_conv(x_nchw, weight, bias, out_channels, *, tile_m=512):
    """mfm (type=1) forward.

    x_nchw:  (B, Cin, H, W) float32  (PyTorch NCHW input)
    weight:  (2*Cout, Cin, K, K)     (PyTorch Conv2d OIHW weights)
    bias:    (2*Cout,)
    returns: (B, Cout, H, W)         == torch.max(*torch.split(conv(x), Cout, 1))
    """
    B, Cin, H, W = x_nchw.shape
    K = weight.shape[-1]
    pad = K // 2
    KKC = K * K * Cin
    HW = H * W

    # ---- glue: stay in NCHW, build "transposed im2col" (B, K*K*Cin, H*W) ----
    x_pad = jnp.pad(x_nchw, ((0, 0), (0, 0), (pad, pad), (pad, pad)))
    cols = [x_pad[:, :, ky:ky + H, kx:kx + W]            # (B, Cin, H, W)
            for ky in range(K) for kx in range(K)]
    patches = jnp.concatenate(cols, axis=1).reshape(B, KKC, HW)

    # lane-dense spatial tiling: tile_m is a multiple of 128; pad HW so the
    # tile divides it exactly (no hard assert on B*H*W anymore).
    tile_m = min(tile_m, pl.cdiv(HW, 128) * 128)
    HW_pad = pl.cdiv(HW, tile_m) * tile_m
    if HW_pad != HW:
        patches = jnp.pad(patches, ((0, 0), (0, 0), (0, HW_pad - HW)))

    # weight (2*Cout, Cin, ky, kx) -> (2*Cout, ky, kx, Cin) -> (2*Cout, KKC)
    # (matches the (ky, kx, cin) ordering of the patch rows above)
    w2 = jnp.transpose(weight, (0, 2, 3, 1)).reshape(2 * out_channels, KKC)
    b2 = bias.reshape(2 * out_channels, 1)

    grid = (B, HW_pad // tile_m)
    flops = 2 * B * HW_pad * KKC * (2 * out_channels)
    bytes_accessed = 4 * (B * KKC * HW_pad
                          + 2 * out_channels * (KKC + 1)
                          + B * out_channels * HW_pad)

    out = pl.pallas_call(
        mfm_kernel,
        out_shape=jax.ShapeDtypeStruct((B, out_channels, HW_pad), x_nchw.dtype),
        grid_spec=pltpu.PrefetchScalarGridSpec(
            num_scalar_prefetch=0,
            grid=grid,
            in_specs=[
                # fused weights + bias: constant index_map -> stays resident
                pl.BlockSpec((2 * out_channels, KKC), lambda b, i: (0, 0)),
                pl.BlockSpec((2 * out_channels, 1), lambda b, i: (0, 0)),
                # patch columns for this (batch, spatial tile)
                pl.BlockSpec((1, KKC, tile_m), lambda b, i: (b, 0, i)),
            ],
            out_specs=pl.BlockSpec((1, out_channels, tile_m),
                                   lambda b, i: (b, 0, i)),
        ),
        compiler_params=pltpu.CompilerParams(
            dimension_semantics=("parallel", "parallel")),
        cost_estimate=pl.CostEstimate(flops=flops, transcendentals=0,
                                      bytes_accessed=bytes_accessed),
    )(w2, b2, patches)

    # drop spatial padding; result is already NCHW -> just reshape (free)
    return out[:, :, :HW].reshape(B, out_channels, H, W)


def _reference(x_nchw, weight, bias, out_channels):
    pad = weight.shape[-1] // 2
    y = jax.lax.conv_general_dilated(
        x_nchw, weight, window_strides=(1, 1),
        padding=((pad, pad), (pad, pad)),
        dimension_numbers=("NCHW", "OIHW", "NCHW"))
    y = y + bias.reshape(1, -1, 1, 1)
    return jnp.maximum(y[:, :out_channels], y[:, out_channels:])


if __name__ == "__main__":
    # Small shapes consistent with the module: mfm(in_channels=4, out_channels=8)
    B, Cin, H, W = 2, 4, 16, 16
    Cout = 8
    K = 3

    key = jax.random.PRNGKey(0)
    kx, kw, kb = jax.random.split(key, 3)
    x = jax.random.normal(kx, (B, Cin, H, W), dtype=jnp.float32)
    weight = 0.1 * jax.random.normal(kw, (2 * Cout, Cin, K, K), dtype=jnp.float32)
    bias = 0.1 * jax.random.normal(kb, (2 * Cout,), dtype=jnp.float32)

    out = mfm_conv(x, weight, bias, Cout)
    out = jax.block_until_ready(out)

    ref = _reference(x, weight, bias, Cout)
    assert out.shape == (B, Cout, H, W)
    assert jnp.allclose(out, ref, atol=5e-2, rtol=5e-2), "mismatch vs reference"

    print("KERNEL_OK")
</pallas_src>

<mosaic_0001>
module attributes {stable_mosaic.version = 11 : i64} {
  func.func @mfm_kernel(%arg0: i32, %arg1: i32, %arg2: memref<16x36xf32, #tpu.memory_space<vmem>>, %arg3: memref<16x1xf32, #tpu.memory_space<vmem>>, %arg4: memref<1x36x256xf32, #tpu.memory_space<vmem>>, %arg5: memref<1x8x256xf32, #tpu.memory_space<vmem>>) attributes {dimension_semantics = [#tpu.dimension_semantics<parallel>, #tpu.dimension_semantics<parallel>], iteration_bounds = array<i64: 2, 1>, scalar_prefetch = 0 : i64, scratch_operands = 0 : i64, tpu.core_type = #tpu.core_type<tc>, window_params = [{pipeline_mode = #tpu.pipeline_mode<synchronous>, transform_indices = @transform_0, window_bounds = array<i64: 16, 36>}, {pipeline_mode = #tpu.pipeline_mode<synchronous>, transform_indices = @transform_1, window_bounds = array<i64: 16, 1>}, {transform_indices = @transform_2, window_bounds = array<i64: 1, 36, 256>}, {transform_indices = @transform_3, window_bounds = array<i64: 1, 8, 256>}]} {
    %c0 = arith.constant 0 : index
    %c0_0 = arith.constant 0 : index
    %0 = vector.load %arg2[%c0, %c0_0] : memref<16x36xf32, #tpu.memory_space<vmem>>, vector<16x36xf32>
    %c0_1 = arith.constant 0 : index
    %c0_2 = arith.constant 0 : index
    %c0_3 = arith.constant 0 : index
    %1 = vector.load %arg4[%c0_1, %c0_2, %c0_3] : memref<1x36x256xf32, #tpu.memory_space<vmem>>, vector<1x36x256xf32>
    %2 = vector.shape_cast %1 : vector<1x36x256xf32> to vector<36x256xf32>
    %cst = arith.constant dense<0.000000e+00> : vector<16x256xf32>
    %3 = tpu.matmul %0, %2, %cst {dimension_numbers = #tpu.dot_dimension_numbers<[1], [0], [0], [1], [0, 0, 1, 1], [], []>} : vector<16x36xf32>, vector<36x256xf32>, vector<16x256xf32> -> vector<16x256xf32>
    %c0_4 = arith.constant 0 : index
    %c0_5 = arith.constant 0 : index
    %4 = vector.load %arg3[%c0_4, %c0_5] : memref<16x1xf32, #tpu.memory_space<vmem>>, vector<16x1xf32>
    %5 = vector.broadcast %4 : vector<16x1xf32> to vector<16x256xf32>
    %6 = arith.addf %3, %5 : vector<16x256xf32>
    %7 = vector.extract_strided_slice %6 {offsets = [0, 0], sizes = [8, 256], strides = [1, 1]} : vector<16x256xf32> to vector<8x256xf32>
    %8 = vector.extract_strided_slice %6 {offsets = [8, 0], sizes = [8, 256], strides = [1, 1]} : vector<16x256xf32> to vector<8x256xf32>
    %9 = arith.maximumf %7, %8 : vector<8x256xf32>
    %c0_6 = arith.constant 0 : index
    %c0_7 = arith.constant 0 : index
    %c0_8 = arith.constant 0 : index
    %10 = vector.load %arg5[%c0_6, %c0_7, %c0_8] : memref<1x8x256xf32, #tpu.memory_space<vmem>>, vector<1x8x256xf32>
    %11 = vector.shape_cast %10 : vector<1x8x256xf32> to vector<8x256xf32>
    %12 = vector.shape_cast %9 : vector<8x256xf32> to vector<1x8x256xf32>
    tpu.vector_store %arg5[%c0_6, %c0_7, %c0_8], %12 {strides = array<i32>} : memref<1x8x256xf32, #tpu.memory_space<vmem>>, vector<1x8x256xf32>,
    return
  }
  func.func @transform_0(%arg0: i32, %arg1: i32) -> (i32, i32) {
    %c0_i32 = arith.constant 0 : i32
    %c0_i32_0 = arith.constant 0 : i32
    %c0_i32_1 = arith.constant 0 : i32
    return %c0_i32, %c0_i32_0 : i32, i32
  }
  func.func @transform_1(%arg0: i32, %arg1: i32) -> (i32, i32) {
    %c0_i32 = arith.constant 0 : i32
    %c0_i32_0 = arith.constant 0 : i32
    %c0_i32_1 = arith.constant 0 : i32
    return %c0_i32, %c0_i32_0 : i32, i32
  }
  func.func @transform_2(%arg0: i32, %arg1: i32) -> (i32, i32, i32) {
    %c0_i32 = arith.constant 0 : i32
    %c0_i32_0 = arith.constant 0 : i32
    return %arg0, %c0_i32, %arg1 : i32, i32, i32
  }
  func.func @transform_3(%arg0: i32, %arg1: i32) -> (i32, i32, i32) {
    %c0_i32 = arith.constant 0 : i32
    %c0_i32_0 = arith.constant 0 : i32
    return %arg0, %c0_i32, %arg1 : i32, i32, i32
  }
}

</mosaic_0001>

<bundles_post_ra>
// kernel: tpu_custom_call.1
= control target key start
LH: loop header
LB: loop body
LE: loop exit
PB: predicated region body
PF: predicated region fallthrough
CT: control target
= control target key end

     0   :  { %8 = vsyncpa [#allocation3], 0  ;;  %s729_s0 = inlined_call_operand.vmem [shape: f32[16,36], index: 0, kind: input, shape index: {}]   ;;  %s730_s1 = inlined_call_operand.vmem [shape: f32[16,1], index: 1, kind: input, shape index: {}]   ;;  %s731_s2 = inlined_call_operand.vmem [shape: f32[2,36,256], index: 2, kind: input, shape index: {}]   ;;  %s732_s3 = inlined_call_operand.hbm [shape: f32[2,8,256], index: 3, kind: output, shape index: {}]  }
   0x1   :  { %10 = vsyncpa [#allocation3 + $0x1], 0  ;;  %s605_s12 = smov 0   ;;  %s607_s13 = smov 0  }
   0x2   :  { %s609_s14 = smov 0   ;;  %s611_s15 = smov 0  }
   0x3   :  { %s613_s16 = smov 0   ;;  %s615_s17 = smov 0  }
   0x4 LB: > { %s412_s18 = sadd.s32 4294967295, %s580_s17   ;;  %s413_s19 = sadd.s32 4294967294, %s580_s17   ;;  %s580_s17 = sphi %s615_s17, %s16_s17   ;;  %s576_s16 = sphi %s613_s16, %s739_s16   ;;  %s572_s15 = sphi %s611_s15, %s738_s15   ;;  %s568_s14 = sphi %s609_s14, %s737_s14   ;;  %s564_s13 = sphi %s607_s13, %s736_s13   ;;  %s560_s12 = sphi %s605_s12, %s735_s12  }
   0x5   : > { %s28_s20 = sadd.s32 1, %s576_s16  ;;  %s107_s21 = sadd.s32 1, %s568_s14 }
   0x6   : > { %p30_p0 = scmp.ge.s32.totalorder %s28_s20, 2  ;;  %p117_p1 = scmp.ne.s32.totalorder %s568_s14, %s564_s13 }
   0x7   : > { %p118_p2 = scmp.eq.s32.totalorder %s412_s18, 1  ;;  %p123_p3 = scmp.ne.s32.totalorder %s564_s13, %s560_s12 }
   0x8   : > { %s741_s20 = smov (%p30_p0, %s28_s20), 0  ;;  %p124_p5 = scmp.eq.s32.totalorder %s413_s19, 1 }
   0x9   : > { %p645_p4 = por %p118_p2, %p117_p1  ;;  %s102_s23 = ssub.s32 %s576_s16, %s741_s20 }
   0xa   : > { %p416_p6 = scmp.ge.s32.totalorder %s580_s17, 1  ;;  %p105_p7 = scmp.eq.s32.totalorder %s102_s23, 0 }
   0xb   : > { %p652_p8 = por %p124_p5, %p123_p3  ;;  %p161_p9 = scmp.lt.s32.totalorder %s580_s17, 3 }
   0xc   : > { %s658_s25 = scalar_select %p105_p7, %s568_s14, %s107_s21  }
   0xd   : > { %p162_p10 = pnand %p416_p6, %p161_p9 }
   0xe   : > { %p190_p11 = scmp.lt.s32.totalorder (!%p162_p10), %s572_s15, 1  ;;  %v582_v0 = vmov (!%p162_p10), 0.0   ;;  %v212_v1 = vld [vmem:[%s730_s1] sm:$0xff] (!%p162_p10)  ;;  %v583_v2 = vmov (!%p162_p10), 0   ;;  %v213_v3 = vld [vmem:[%s730_s1 + $0x8] sm:$0xff] (!%p162_p10)  ;;  %vm231_vm0 = vcmask (!%p162_p10), 1043456  }
   0xf   : > { %165 = sbr.rel (%p162_p10) target bundleno = 271 (0x10f), region = 32  ;;  %302 = vmatprep.mubr.f32.mxu0 (!%p162_p10), %v582_v0  ;;  %308 = vmatprep.mubr.f32.mxu1 (!%p162_p10), %v582_v0  ;;  %v200_v18 = vld [vmem:[%s729_s0] sm:$0xff] (!%p162_p10)  ;;  %vm224_vm1 = vcmask (!%p162_p10), 293888   ;;  %v201_v19 = vld [vmem:[%s729_s0 + $0x8] sm:$0xff] (!%p162_p10)  ;;  %s186_s18 = sand.u32 (!%p162_p10), 1, %s564_s13  }
  0x10   : > { %501 = vset.pattern.permute.xlu0 (!%p162_p10), %v583_v2  ;;  %s417_s19 = sshll.u32 (!%p162_p10), %s186_s18, 4  ;;  %s428_s21 = sshll.u32 (!%p162_p10), %s572_s15, 8 }
  0x11   : > { %216 = vperm.xlu0 (!%p162_p10), %501, %v212_v1   ;;  %s188_s23 = scalar_lea.vmem (!%p162_p10), [#allocation2], %s417_s19  ;;  %s320_s30 = scalar_lea.sflag (!%p162_p10), [#allocation3], %s186_s18 }
  0x12   : > { %s336_s26 = sshll.u32 (!%p162_p10), %s188_s23, 4  ;;  %s584_s4 = smov (!%p162_p10), [#allocation2]   ;;  %s684_s26 = int_to_ptr.vmem [resolvable:$true] %s336_s26 }
  0x13   : > { %s506_s5 = sshll.u32 (!%p162_p10), %s584_s4, 4  ;;  %s507_s5 = int_to_ptr.vmem [resolvable:$false] %s506_s5 }
  0x14   : > { %s508_s6 = scalar_lea.vmem (!%p162_p10), %s507_s5, 512  ;;  %p509_p1 = scmp.lt.s32.totalorder (!%p162_p10), %s684_s26, %s507_s5 }
  0x15   : > { %221 = vperm.xlu0 (!%p162_p10), %501, %v213_v3  }
  0x16   : > { %s191_s28 = scalar_select %p190_p11, %s572_s15, 1 }
  0x17   : > { %s502_s15 = scalar_lea.vmem %s684_s26, 256 }
  0x18   : > { %s443_s29 = smul.u32 80, %s191_s28  ;;  %p503_p12 = scmp.ne.s32.totalorder %s684_s26, %s502_s15 }
  0x19   : > { %p510_p2 = scmp.lt.s32.totalorder %s508_s6, %s502_s15 }
  0x1a   : > { %s197_s7 = scalar_lea.vmem %s731_s2, %s443_s29  ;;  %s682_s29 = scalar_lea.hbm %s732_s3, %s428_s21 }
  0x1b   : > { %v203_v4 = vld [vmem:[%s197_s7 + $0x8] sm:$0xff]  ;;  %v205_v5 = vld [vmem:[%s197_s7 + $0x18] sm:$0xff]  ;;  %v202_v6 = vld [vmem:[%s197_s7] sm:$0xff]  ;;  %p504_p13 = pnand %p503_p12, %p645_p4  ;;  %p511_p3 = por %p510_p2, %p509_p1 }
  0x1c   : > { %v429_v7 = vpack.c.bf16 %v205_v5, %v203_v4  ;;  %v204_v8 = vld [vmem:[%s197_s7 + $0x10] sm:$0xff]  ;;  %v207_v9 = vld [vmem:[%s197_s7 + $0x28] sm:$0xff]  ;;  %v209_v10 = vld [vmem:[%s197_s7 + $0x38] sm:$0xff] }
  0x1d   : > { %v431_v11 = vpack.c.bf16 %v204_v8, %v202_v6  ;;  %v433_v12 = vpack.c.bf16 %v209_v10, %v207_v9  ;;  %v206_v13 = vld [vmem:[%s197_s7 + $0x20] sm:$0xff]  ;;  %v208_v14 = vld [vmem:[%s197_s7 + $0x30] sm:$0xff]  ;;  %v211_v16 = vld [vmem:[%s197_s7 + $0x48] sm:$0xf]  ;;  %p505_p0 = pneg %p504_p13 }
  0x1e   : > { %430 = vmatprep.subr.bf16.mxu0 %v429_v7  ;;  %437 = vmatprep.subr.bf16.mxu1 %v429_v7  ;;  %v435_v15 = vpack.c.bf16 %v208_v14, %v206_v13  ;;  %v210_v17 = vld [vmem:[%s197_s7 + $0x40] sm:$0xf] }
  0x1f   : > { %432 = vmatpush1.bf16.msra.mxu0 %v431_v11  ;;  %440 = vmatpush1.bf16.msra.mxu1 %v431_v11  ;;  %p512_p5 = pnand %p511_p3, %p505_p0 }
  0x20   : > { %434 = vmatprep.subr.bf16.mxu0 %v433_v12  ;;  %438 = vmatprep.subr.bf16.mxu1 %v433_v12 }
  0x23   : > { %436 = vmatpush1.bf16.msra.mxu0 %v435_v15  ;;  %441 = vmatpush1.bf16.msra.mxu1 %v435_v15 }
  0x24   : > { %419 = vmatprep.subr.msk.mxu0 %vm231_vm0, %v211_v16  ;;  %439 = vmatprep.subr.msk.mxu1 %vm231_vm0, %v211_v16 }
  0x27   : > { %420 = vmatpush1.msk.msra.mxu0 %vm231_vm0, %v210_v17  ;;  %442 = vmatpush1.msk.msra.mxu1 %vm231_vm0, %v210_v17 }
  0x28   : > { %421 = vmatmul.mubr.msk.f32.vlgmr.msra.gmra.mrb[0].mxu0 %vm224_vm1, %v200_v18  ;;  %422 = vmatmul.mubr.msk.f32.vlgmr.msra.gmra.mrb[0].mxu1 %vm224_vm1, %v201_v19 }
  0x90   : > { %v217_v20 = vpop.permute.xlu0 %216 }
  0x94   : > { %v222_v21 = vpop.permute.xlu0 %221 }
  0xfb   : > { %v304_v22 = vpop.f32.mrb[0].mxu0  ;;  %v310_v23 = vpop.f32.mrb[0].mxu1 }
  0xfc   : > { %v305_v24 = vadd.f32 %v304_v22, %v217_v20  ;;  %v311_v25 = vadd.f32 %v310_v23, %v222_v21  ;;  %v306_v26 = vpop.f32.mrb[1].mxu0  ;;  %v312_v27 = vpop.f32.mrb[1].mxu1 }
  0xfd   : > { %v307_v28 = vadd.f32 %v306_v26, %v217_v20  ;;  %v313_v29 = vadd.f32 %v312_v27, %v222_v21 }
  0xfe   : > { %v315_v30 = vmax.f32 %v305_v24, %v311_v25 }
  0xff   : > { %v316_v31 = vmax.f32 %v307_v28, %v313_v29 }
 0x100   : > { %317 = vst [vmem:[%s188_s23] sm:$0xff] %v315_v30 }
 0x101   : > { %318 = vst [vmem:[%s188_s23 + $0x8] sm:$0xff] %v316_v31 }
 0x102   : > { %515 = shalt.err (!%p512_p5)
}
 0x103   : > { %s516_s7 = scalar_lea.hbm %s682_s29, 256  ;;  %s520_s10 = scalar_lea.hbm %s732_s3, 512 }
 0x104   : > { %p517_p6 = scmp.ne.s32.totalorder %s682_s29, %s516_s7  ;;  %p521_p10 = scmp.lt.u32.totalorder %s682_s29, %s732_s3 }
 0x105   : > { %p522_p11 = scmp.lt.u32.totalorder %s520_s10, %s516_s7  ;;  %p524_p13 = scmp.lt.u32.totalorder %s516_s7, %s682_s29 }
 0x106   : > { %p518_p7 = pnand %p517_p6, %p645_p4 }
 0x107   : > { %p523_p12 = por %p522_p11, %p521_p10 }
 0x108   : > { %p519_p9 = pneg %p518_p7 }
 0x109   : > { %p525_p0 = por %p524_p13, %p523_p12 }
 0x10b   : > { %p526_p1 = pnand %p525_p0, %p519_p9 }
 0x10d   : > { %529 = shalt.err (!%p526_p1)
}
 0x10e   : > { %444 = dma.vmem_to_hbm [thread:$0]  (%p645_p4), %s684_s26, 256, %s682_s29, %s320_s30  }
 0x10f PF: > { %p450_p2 = scmp.ge.s32.totalorder %s580_s17, 2  ;;  %s348_s19 = sand.u32 1, %s560_s12  }
 0x110   : > { %s349_s21 = scalar_lea.sflag [#allocation3], %s348_s19 }
 0x111   : > { %p447_p3 = pnand %p450_p2, %p652_p8 }
 0x113   : > { %555 = dma.done.wait (!%p447_p3), %s349_s21, 256  }
 0x114   : > { %557 = vsyncadd (!%p447_p3), %s349_s21, 4294967040  ;;  %s16_s17 = sadd.s32 1, %s580_s17   ;;  %s735_s12 = smov %s564_s13 }
 0x115   : > { %p13_p5 = scmp.ge.s32.totalorder %s16_s17, 4   ;;  %s736_s13 = smov %s568_s14 }
 0x116   : > { %s737_s14 = smov %s658_s25  ;;  %s738_s15 = smov %s576_s16 }
 0x117   : > { %s739_s16 = smov %s741_s20  ;;  %15 = sbr.rel (!%p13_p5) target bundleno = 4 (0x4), region = 67 }
 0x11e   :  { %354 = vsyncpa [#allocation3], 1 }
 0x11f   :  { %356 = vsyncpa [#allocation3 + $0x1], 1 }

</bundles_post_ra>
